<compile_context>
chip_gen: v5e
topology: v5e:2x2
jax: 0.10.0
libtpu: 0.0.40
codegen_flags: <defaults>
</compile_context>

<pallas_src>
import math

import jax
import jax.numpy as jnp
from jax.experimental import pallas as pl
from jax.experimental.pallas import tpu as pltpu

_LN_EPS = 1e-5


def _layernorm(h, gamma, beta, eps=_LN_EPS):
    # torch.nn.LayerNorm over the last dim (biased variance, eps inside rsqrt).
    # Variance as E[h^2] - mu^2: the two reductions are independent (both can
    # issue on the XLU without serializing behind mu).
    mu = jnp.mean(h, axis=-1, keepdims=True)
    ms = jnp.mean(h * h, axis=-1, keepdims=True)
    var = jnp.maximum(ms - mu * mu, 0.0)
    return (h - mu) * jax.lax.rsqrt(var + eps) * gamma + beta


def _make_kernel(hidden, h4, action_dim):
    """Build the fused forward kernel with static feature widths baked in."""

    def kernel(x_ref, w1_ref, w2_ref, w3_ref, w4_ref, slab_ref, o_ref):
        # One packed (10, W) f32 slab holds every bias / LayerNorm parameter.
        slab = slab_ref[...]
        b1, g1, be1 = slab[0:1, :hidden], slab[1:2, :hidden], slab[2:3, :hidden]
        b2, g2, be2 = slab[3:4, :h4], slab[4:5, :h4], slab[5:6, :h4]
        b3, g3, be3 = slab[6:7, :h4], slab[7:8, :h4], slab[8:9, :h4]
        b4 = slab[9:10, :action_dim]

        # fc1 -> relu -> ln1  (bf16 MXU operands, f32 accumulation & elementwise)
        x = x_ref[...].astype(jnp.bfloat16)
        h = jnp.dot(x, w1_ref[...], preferred_element_type=jnp.float32) + b1
        h = jnp.maximum(h, 0.0)
        h = _layernorm(h, g1, be1)

        # fc2 -> relu -> ln2
        h = jnp.dot(h.astype(jnp.bfloat16), w2_ref[...],
                    preferred_element_type=jnp.float32) + b2
        h = jnp.maximum(h, 0.0)
        h = _layernorm(h, g2, be2)

        # fc3 -> relu -> ln3
        h = jnp.dot(h.astype(jnp.bfloat16), w3_ref[...],
                    preferred_element_type=jnp.float32) + b3
        h = jnp.maximum(h, 0.0)
        h = _layernorm(h, g3, be3)

        # fc4 (Q-value head): full f32 so near-tied Q-values keep argmax parity
        # with the f32 reference; K and N are tiny so the extra cost is nil.
        # Narrow store: output block is (batch_tile, action_dim).
        o_ref[...] = (jnp.dot(h, w4_ref[...], preferred_element_type=jnp.float32)
                      + b4).astype(o_ref.dtype)

    return kernel


def _num_tensorcores_per_chip():
    try:
        kind = jax.devices()[0].device_kind.lower()
    except Exception:
        return 1
    # v7x packs two TensorCores per chip; v5e/v6e have one.
    return 2 if ("v7" in kind or "7x" in kind) else 1


def _round8(n):
    return max(8, -(-n // 8) * 8)


def _pick_batch_tile(b_rows, n_cores=None):
    """Per-generation batch tiling.

    v7x (2 TCs): for B >= 64 give the 'parallel' batch axis >= 2 grid steps so
    both TensorCores get work.  Single-TC chips (v5e/v6e): one grid step up to
    1024 rows, then 1024-row tiles to amortize the ~0.35us per-step overhead.
    Tiles are capped at 1024 rows so double-buffered VMEM stays ~1 MB even on
    v7x's 64 MiB VMEM."""
    if n_cores is None:
        n_cores = _num_tensorcores_per_chip()
    if n_cores >= 2 and b_rows >= 64:
        return min(_round8(-(-b_rows // 2)), 1024)
    if b_rows <= 1024:
        return _round8(b_rows)
    return 1024


def prepare_params(params):
    """ONE-TIME preprocessing of raw (in,out) params into kernel-ready form.

    Returns (w1_bf16, w2_bf16, w3_bf16, w4_f32, slab) where slab is a packed
    (10, W) f32 array: rows [b1, g1, be1, b2, g2, be2, b3, g3, be3, b4], each
    zero-padded on the right to W = max(hidden, action_dim)."""
    (w1, b1, g1, be1, w2, b2, g2, be2, w3, b3, g3, be3, w4, b4) = params
    hidden = w1.shape[1]
    action_dim = w4.shape[1]
    width = max(hidden, action_dim)

    def row(v):
        v = jnp.asarray(v, jnp.float32).reshape(-1)
        return jnp.pad(v, (0, width - v.shape[0]))

    slab = jnp.stack([row(v) for v in (b1, g1, be1, b2, g2, be2, b3, g3, be3, b4)])
    return (w1.astype(jnp.bfloat16), w2.astype(jnp.bfloat16),
            w3.astype(jnp.bfloat16), w4.astype(jnp.float32), slab)


def qnet_forward(x, prepared_params, *, batch_tile=None):
    """x: (B, input_dim) float32 or bfloat16. Returns (B, action_dim) float32.

    `prepared_params` must come from prepare_params() (called once, reused)."""
    w1b, w2b, w3b, w4f, slab = prepared_params
    B, D_in = x.shape
    hidden = w1b.shape[1]
    h4 = w2b.shape[1]
    action_dim = w4f.shape[1]

    if batch_tile is None:
        batch_tile = _pick_batch_tile(B)
    B_pad = -(-B // batch_tile) * batch_tile
    if B_pad != B:
        x = jnp.pad(x, ((0, B_pad - B), (0, 0)))

    kernel = _make_kernel(hidden, h4, action_dim)

    def const_spec(a):
        # Whole-array block with a constant index_map: Pallas does not re-DMA
        # these across grid steps.
        return pl.BlockSpec(a.shape, lambda i: (0, 0))

    out = pl.pallas_call(
        kernel,
        out_shape=jax.ShapeDtypeStruct((B_pad, action_dim), jnp.float32),
        grid=(B_pad // batch_tile,),
        in_specs=[pl.BlockSpec((batch_tile, D_in), lambda i: (i, 0)),
                  const_spec(w1b), const_spec(w2b), const_spec(w3b),
                  const_spec(w4f), const_spec(slab)],
        # Narrow output block: last dim equals the full array dim (legal) and
        # output HBM bytes drop ~32x vs a 128-lane padded slab.
        out_specs=pl.BlockSpec((batch_tile, action_dim), lambda i: (i, 0)),
        compiler_params=pltpu.CompilerParams(
            dimension_semantics=("parallel",)),
    )(x, w1b, w2b, w3b, w4f, slab)
    return out[:B]


def init_qnet_params(key, input_dim, action_dim):
    """Deterministic init matching Qnet.__init__ shapes.

    Linear weights generated in torch (out, in) convention with
    U(-1/sqrt(fan_in), 1/sqrt(fan_in)), then transposed to (in, out) for the
    kernel.  LayerNorm params follow torch defaults (gamma=1, beta=0)."""
    hidden = 2 ** int(math.log2(input_dim))
    h4 = hidden // 4

    dims = [(input_dim, hidden), (hidden, h4), (h4, h4), (h4, action_dim)]
    keys = jax.random.split(key, 2 * len(dims))
    linears = []
    for li, (fin, fout) in enumerate(dims):
        bound = 1.0 / math.sqrt(fin)
        w = jax.random.uniform(keys[2 * li], (fout, fin),
                               minval=-bound, maxval=bound, dtype=jnp.float32)
        b = jax.random.uniform(keys[2 * li + 1], (fout,),
                               minval=-bound, maxval=bound, dtype=jnp.float32)
        linears.append((w.T, b.reshape(1, fout)))          # pre-transpose for x @ W

    (w1, b1), (w2, b2), (w3, b3), (w4, b4) = linears
    g1, be1 = jnp.ones((1, hidden), jnp.float32), jnp.zeros((1, hidden), jnp.float32)
    g2, be2 = jnp.ones((1, h4), jnp.float32), jnp.zeros((1, h4), jnp.float32)
    g3, be3 = jnp.ones((1, h4), jnp.float32), jnp.zeros((1, h4), jnp.float32)
    return (w1, b1, g1, be1, w2, b2, g2, be2, w3, b3, g3, be3, w4, b4)


def qnet_reference(x, params):
    """Pure-JAX f32 reference (same math as the PyTorch forward)."""
    (w1, b1, g1, be1, w2, b2, g2, be2, w3, b3, g3, be3, w4, b4) = params

    def ln(h, gamma, beta, eps=_LN_EPS):
        mu = jnp.mean(h, axis=-1, keepdims=True)
        var = jnp.mean((h - mu) ** 2, axis=-1, keepdims=True)
        return (h - mu) * jax.lax.rsqrt(var + eps) * gamma + beta

    h = ln(jnp.maximum(x @ w1 + b1, 0.0), g1, be1)
    h = ln(jnp.maximum(h @ w2 + b2, 0.0), g2, be2)
    h = ln(jnp.maximum(h @ w3 + b3, 0.0), g3, be3)
    return h @ w4 + b4


if __name__ == "__main__":
    input_dim = 128      # -> hidden = 128, hidden/4 = 32
    action_dim = 4
    batch = 16

    key = jax.random.PRNGKey(0)
    kx, kp = jax.random.split(key)
    x = jax.random.normal(kx, (batch, input_dim), dtype=jnp.float32)
    params = init_qnet_params(kp, input_dim, action_dim)

    prepared = prepare_params(params)          # one-time weight preprocessing
    out = qnet_forward(x, prepared)
    out = jax.block_until_ready(out)

    ref = qnet_reference(x, params)
    assert out.shape == (batch, action_dim)
    # Looser tolerance because fc1-fc3 matmul operands are bf16 (f32 accumulation);
    # the fc4 head runs fully in f32.
    assert jnp.allclose(out, ref, atol=5e-2, rtol=5e-2), "mismatch vs reference"

    print("KERNEL_OK")
</pallas_src>

<mosaic_0001>
module attributes {stable_mosaic.version = 11 : i64} {
  func.func @kernel(%arg0: i32, %arg1: memref<16x128xf32, #tpu.memory_space<vmem>>, %arg2: memref<128x128xbf16, #tpu.memory_space<vmem>>, %arg3: memref<128x32xbf16, #tpu.memory_space<vmem>>, %arg4: memref<32x32xbf16, #tpu.memory_space<vmem>>, %arg5: memref<32x4xf32, #tpu.memory_space<vmem>>, %arg6: memref<10x128xf32, #tpu.memory_space<vmem>>, %arg7: memref<16x4xf32, #tpu.memory_space<vmem>>) attributes {dimension_semantics = [#tpu.dimension_semantics<parallel>], iteration_bounds = array<i64: 1>, scalar_prefetch = 0 : i64, scratch_operands = 0 : i64, tpu.core_type = #tpu.core_type<tc>, window_params = [{transform_indices = @transform_0, window_bounds = array<i64: 16, 128>}, {pipeline_mode = #tpu.pipeline_mode<synchronous>, transform_indices = @transform_1, window_bounds = array<i64: 128, 128>}, {pipeline_mode = #tpu.pipeline_mode<synchronous>, transform_indices = @transform_2, window_bounds = array<i64: 128, 32>}, {pipeline_mode = #tpu.pipeline_mode<synchronous>, transform_indices = @transform_3, window_bounds = array<i64: 32, 32>}, {pipeline_mode = #tpu.pipeline_mode<synchronous>, transform_indices = @transform_4, window_bounds = array<i64: 32, 4>}, {pipeline_mode = #tpu.pipeline_mode<synchronous>, transform_indices = @transform_5, window_bounds = array<i64: 10, 128>}, {transform_indices = @transform_6, window_bounds = array<i64: 16, 4>}]} {
    %c0 = arith.constant 0 : index
    %c0_0 = arith.constant 0 : index
    %0 = vector.load %arg6[%c0, %c0_0] : memref<10x128xf32, #tpu.memory_space<vmem>>, vector<10x128xf32>
    %1 = vector.extract_strided_slice %0 {offsets = [0, 0], sizes = [1, 128], strides = [1, 1]} : vector<10x128xf32> to vector<1x128xf32>
    %2 = vector.extract_strided_slice %0 {offsets = [1, 0], sizes = [1, 128], strides = [1, 1]} : vector<10x128xf32> to vector<1x128xf32>
    %3 = vector.extract_strided_slice %0 {offsets = [2, 0], sizes = [1, 128], strides = [1, 1]} : vector<10x128xf32> to vector<1x128xf32>
    %4 = vector.extract_strided_slice %0 {offsets = [3, 0], sizes = [1, 32], strides = [1, 1]} : vector<10x128xf32> to vector<1x32xf32>
    %5 = vector.extract_strided_slice %0 {offsets = [4, 0], sizes = [1, 32], strides = [1, 1]} : vector<10x128xf32> to vector<1x32xf32>
    %6 = vector.extract_strided_slice %0 {offsets = [5, 0], sizes = [1, 32], strides = [1, 1]} : vector<10x128xf32> to vector<1x32xf32>
    %7 = vector.extract_strided_slice %0 {offsets = [6, 0], sizes = [1, 32], strides = [1, 1]} : vector<10x128xf32> to vector<1x32xf32>
    %8 = vector.extract_strided_slice %0 {offsets = [7, 0], sizes = [1, 32], strides = [1, 1]} : vector<10x128xf32> to vector<1x32xf32>
    %9 = vector.extract_strided_slice %0 {offsets = [8, 0], sizes = [1, 32], strides = [1, 1]} : vector<10x128xf32> to vector<1x32xf32>
    %10 = vector.extract_strided_slice %0 {offsets = [9, 0], sizes = [1, 4], strides = [1, 1]} : vector<10x128xf32> to vector<1x4xf32>
    %c0_1 = arith.constant 0 : index
    %c0_2 = arith.constant 0 : index
    %11 = vector.load %arg1[%c0_1, %c0_2] : memref<16x128xf32, #tpu.memory_space<vmem>>, vector<16x128xf32>
    %12 = arith.truncf %11 : vector<16x128xf32> to vector<16x128xbf16>
    %c0_3 = arith.constant 0 : index
    %c0_4 = arith.constant 0 : index
    %13 = vector.load %arg2[%c0_3, %c0_4] : memref<128x128xbf16, #tpu.memory_space<vmem>>, vector<128x128xbf16>
    %cst = arith.constant dense<0.000000e+00> : vector<16x128xf32>
    %14 = tpu.matmul %12, %13, %cst {dimension_numbers = #tpu.dot_dimension_numbers<[1], [0], [0], [1], [0, 0, 1, 1], [], []>} : vector<16x128xbf16>, vector<128x128xbf16>, vector<16x128xf32> -> vector<16x128xf32>
    %15 = vector.broadcast %1 : vector<1x128xf32> to vector<16x128xf32>
    %16 = arith.addf %14, %15 : vector<16x128xf32>
    %cst_5 = arith.constant 0.000000e+00 : f32
    %17 = vector.broadcast %cst_5 : f32 to vector<16x128xf32>
    %18 = arith.maximumf %16, %17 : vector<16x128xf32>
    %cst_6 = arith.constant dense<0.000000e+00> : vector<16xf32>
    %19 = vector.multi_reduction <add>, %18, %cst_6 [1] : vector<16x128xf32> to vector<16xf32>
    %20 = vector.shape_cast %19 : vector<16xf32> to vector<16x1xf32>
    %cst_7 = arith.constant 1.280000e+02 : f32
    %21 = vector.broadcast %cst_7 : f32 to vector<16x1xf32>
    %22 = arith.divf %20, %21 : vector<16x1xf32>
    %23 = arith.mulf %18, %18 : vector<16x128xf32>
    %cst_8 = arith.constant dense<0.000000e+00> : vector<16xf32>
    %24 = vector.multi_reduction <add>, %23, %cst_8 [1] : vector<16x128xf32> to vector<16xf32>
    %25 = vector.shape_cast %24 : vector<16xf32> to vector<16x1xf32>
    %cst_9 = arith.constant 1.280000e+02 : f32
    %26 = vector.broadcast %cst_9 : f32 to vector<16x1xf32>
    %27 = arith.divf %25, %26 : vector<16x1xf32>
    %28 = arith.mulf %22, %22 : vector<16x1xf32>
    %29 = arith.subf %27, %28 : vector<16x1xf32>
    %cst_10 = arith.constant 0.000000e+00 : f32
    %30 = vector.broadcast %cst_10 : f32 to vector<16x1xf32>
    %31 = arith.maximumf %29, %30 : vector<16x1xf32>
    %32 = vector.broadcast %22 : vector<16x1xf32> to vector<16x128xf32>
    %33 = arith.subf %18, %32 : vector<16x128xf32>
    %cst_11 = arith.constant 9.99999974E-6 : f32
    %34 = vector.broadcast %cst_11 : f32 to vector<16x1xf32>
    %35 = arith.addf %31, %34 : vector<16x1xf32>
    %36 = math.rsqrt %35 : vector<16x1xf32>
    %37 = vector.broadcast %36 : vector<16x1xf32> to vector<16x128xf32>
    %38 = arith.mulf %33, %37 : vector<16x128xf32>
    %39 = vector.broadcast %2 : vector<1x128xf32> to vector<16x128xf32>
    %40 = arith.mulf %38, %39 : vector<16x128xf32>
    %41 = vector.broadcast %3 : vector<1x128xf32> to vector<16x128xf32>
    %42 = arith.addf %40, %41 : vector<16x128xf32>
    %43 = arith.truncf %42 : vector<16x128xf32> to vector<16x128xbf16>
    %c0_12 = arith.constant 0 : index
    %c0_13 = arith.constant 0 : index
    %44 = vector.load %arg3[%c0_12, %c0_13] : memref<128x32xbf16, #tpu.memory_space<vmem>>, vector<128x32xbf16>
    %cst_14 = arith.constant dense<0.000000e+00> : vector<16x32xf32>
    %45 = tpu.matmul %43, %44, %cst_14 {dimension_numbers = #tpu.dot_dimension_numbers<[1], [0], [0], [1], [0, 0, 1, 1], [], []>} : vector<16x128xbf16>, vector<128x32xbf16>, vector<16x32xf32> -> vector<16x32xf32>
    %46 = vector.broadcast %4 : vector<1x32xf32> to vector<16x32xf32>
    %47 = arith.addf %45, %46 : vector<16x32xf32>
    %cst_15 = arith.constant 0.000000e+00 : f32
    %48 = vector.broadcast %cst_15 : f32 to vector<16x32xf32>
    %49 = arith.maximumf %47, %48 : vector<16x32xf32>
    %cst_16 = arith.constant dense<0.000000e+00> : vector<16xf32>
    %50 = vector.multi_reduction <add>, %49, %cst_16 [1] : vector<16x32xf32> to vector<16xf32>
    %51 = vector.shape_cast %50 : vector<16xf32> to vector<16x1xf32>
    %cst_17 = arith.constant 3.200000e+01 : f32
    %52 = vector.broadcast %cst_17 : f32 to vector<16x1xf32>
    %53 = arith.divf %51, %52 : vector<16x1xf32>
    %54 = arith.mulf %49, %49 : vector<16x32xf32>
    %cst_18 = arith.constant dense<0.000000e+00> : vector<16xf32>
    %55 = vector.multi_reduction <add>, %54, %cst_18 [1] : vector<16x32xf32> to vector<16xf32>
    %56 = vector.shape_cast %55 : vector<16xf32> to vector<16x1xf32>
    %cst_19 = arith.constant 3.200000e+01 : f32
    %57 = vector.broadcast %cst_19 : f32 to vector<16x1xf32>
    %58 = arith.divf %56, %57 : vector<16x1xf32>
    %59 = arith.mulf %53, %53 : vector<16x1xf32>
    %60 = arith.subf %58, %59 : vector<16x1xf32>
    %cst_20 = arith.constant 0.000000e+00 : f32
    %61 = vector.broadcast %cst_20 : f32 to vector<16x1xf32>
    %62 = arith.maximumf %60, %61 : vector<16x1xf32>
    %63 = vector.broadcast %53 : vector<16x1xf32> to vector<16x32xf32>
    %64 = arith.subf %49, %63 : vector<16x32xf32>
    %cst_21 = arith.constant 9.99999974E-6 : f32
    %65 = vector.broadcast %cst_21 : f32 to vector<16x1xf32>
    %66 = arith.addf %62, %65 : vector<16x1xf32>
    %67 = math.rsqrt %66 : vector<16x1xf32>
    %68 = vector.broadcast %67 : vector<16x1xf32> to vector<16x32xf32>
    %69 = arith.mulf %64, %68 : vector<16x32xf32>
    %70 = vector.broadcast %5 : vector<1x32xf32> to vector<16x32xf32>
    %71 = arith.mulf %69, %70 : vector<16x32xf32>
    %72 = vector.broadcast %6 : vector<1x32xf32> to vector<16x32xf32>
    %73 = arith.addf %71, %72 : vector<16x32xf32>
    %74 = arith.truncf %73 : vector<16x32xf32> to vector<16x32xbf16>
    %c0_22 = arith.constant 0 : index
    %c0_23 = arith.constant 0 : index
    %75 = vector.load %arg4[%c0_22, %c0_23] : memref<32x32xbf16, #tpu.memory_space<vmem>>, vector<32x32xbf16>
    %cst_24 = arith.constant dense<0.000000e+00> : vector<16x32xf32>
    %76 = tpu.matmul %74, %75, %cst_24 {dimension_numbers = #tpu.dot_dimension_numbers<[1], [0], [0], [1], [0, 0, 1, 1], [], []>} : vector<16x32xbf16>, vector<32x32xbf16>, vector<16x32xf32> -> vector<16x32xf32>
    %77 = vector.broadcast %7 : vector<1x32xf32> to vector<16x32xf32>
    %78 = arith.addf %76, %77 : vector<16x32xf32>
    %cst_25 = arith.constant 0.000000e+00 : f32
    %79 = vector.broadcast %cst_25 : f32 to vector<16x32xf32>
    %80 = arith.maximumf %78, %79 : vector<16x32xf32>
    %cst_26 = arith.constant dense<0.000000e+00> : vector<16xf32>
    %81 = vector.multi_reduction <add>, %80, %cst_26 [1] : vector<16x32xf32> to vector<16xf32>
    %82 = vector.shape_cast %81 : vector<16xf32> to vector<16x1xf32>
    %cst_27 = arith.constant 3.200000e+01 : f32
    %83 = vector.broadcast %cst_27 : f32 to vector<16x1xf32>
    %84 = arith.divf %82, %83 : vector<16x1xf32>
    %85 = arith.mulf %80, %80 : vector<16x32xf32>
    %cst_28 = arith.constant dense<0.000000e+00> : vector<16xf32>
    %86 = vector.multi_reduction <add>, %85, %cst_28 [1] : vector<16x32xf32> to vector<16xf32>
    %87 = vector.shape_cast %86 : vector<16xf32> to vector<16x1xf32>
    %cst_29 = arith.constant 3.200000e+01 : f32
    %88 = vector.broadcast %cst_29 : f32 to vector<16x1xf32>
    %89 = arith.divf %87, %88 : vector<16x1xf32>
    %90 = arith.mulf %84, %84 : vector<16x1xf32>
    %91 = arith.subf %89, %90 : vector<16x1xf32>
    %cst_30 = arith.constant 0.000000e+00 : f32
    %92 = vector.broadcast %cst_30 : f32 to vector<16x1xf32>
    %93 = arith.maximumf %91, %92 : vector<16x1xf32>
    %94 = vector.broadcast %84 : vector<16x1xf32> to vector<16x32xf32>
    %95 = arith.subf %80, %94 : vector<16x32xf32>
    %cst_31 = arith.constant 9.99999974E-6 : f32
    %96 = vector.broadcast %cst_31 : f32 to vector<16x1xf32>
    %97 = arith.addf %93, %96 : vector<16x1xf32>
    %98 = math.rsqrt %97 : vector<16x1xf32>
    %99 = vector.broadcast %98 : vector<16x1xf32> to vector<16x32xf32>
    %100 = arith.mulf %95, %99 : vector<16x32xf32>
    %101 = vector.broadcast %8 : vector<1x32xf32> to vector<16x32xf32>
    %102 = arith.mulf %100, %101 : vector<16x32xf32>
    %103 = vector.broadcast %9 : vector<1x32xf32> to vector<16x32xf32>
    %104 = arith.addf %102, %103 : vector<16x32xf32>
    %c0_32 = arith.constant 0 : index
    %c0_33 = arith.constant 0 : index
    %105 = vector.load %arg5[%c0_32, %c0_33] : memref<32x4xf32, #tpu.memory_space<vmem>>, vector<32x4xf32>
    %cst_34 = arith.constant dense<0.000000e+00> : vector<16x4xf32>
    %106 = tpu.matmul %104, %105, %cst_34 {dimension_numbers = #tpu.dot_dimension_numbers<[1], [0], [0], [1], [0, 0, 1, 1], [], []>} : vector<16x32xf32>, vector<32x4xf32>, vector<16x4xf32> -> vector<16x4xf32>
    %107 = vector.broadcast %10 : vector<1x4xf32> to vector<16x4xf32>
    %108 = arith.addf %106, %107 : vector<16x4xf32>
    %c0_35 = arith.constant 0 : index
    %c0_36 = arith.constant 0 : index
    %109 = vector.load %arg7[%c0_35, %c0_36] : memref<16x4xf32, #tpu.memory_space<vmem>>, vector<16x4xf32>
    tpu.vector_store %arg7[%c0_35, %c0_36], %108 {strides = array<i32>} : memref<16x4xf32, #tpu.memory_space<vmem>>, vector<16x4xf32>,
    return
  }
  func.func @transform_0(%arg0: i32) -> (i32, i32) {
    %c0_i32 = arith.constant 0 : i32
    %c0_i32_0 = arith.constant 0 : i32
    return %arg0, %c0_i32 : i32, i32
  }
  func.func @transform_1(%arg0: i32) -> (i32, i32) {
    %c0_i32 = arith.constant 0 : i32
    %c0_i32_0 = arith.constant 0 : i32
    %c0_i32_1 = arith.constant 0 : i32
    return %c0_i32, %c0_i32_0 : i32, i32
  }
  func.func @transform_2(%arg0: i32) -> (i32, i32) {
    %c0_i32 = arith.constant 0 : i32
    %c0_i32_0 = arith.constant 0 : i32
    %c0_i32_1 = arith.constant 0 : i32
    return %c0_i32, %c0_i32_0 : i32, i32
  }
  func.func @transform_3(%arg0: i32) -> (i32, i32) {
    %c0_i32 = arith.constant 0 : i32
    %c0_i32_0 = arith.constant 0 : i32
    %c0_i32_1 = arith.constant 0 : i32
    return %c0_i32, %c0_i32_0 : i32, i32
  }
  func.func @transform_4(%arg0: i32) -> (i32, i32) {
    %c0_i32 = arith.constant 0 : i32
    %c0_i32_0 = arith.constant 0 : i32
    %c0_i32_1 = arith.constant 0 : i32
    return %c0_i32, %c0_i32_0 : i32, i32
  }
  func.func @transform_5(%arg0: i32) -> (i32, i32) {
    %c0_i32 = arith.constant 0 : i32
    %c0_i32_0 = arith.constant 0 : i32
    %c0_i32_1 = arith.constant 0 : i32
    return %c0_i32, %c0_i32_0 : i32, i32
  }
  func.func @transform_6(%arg0: i32) -> (i32, i32) {
    %c0_i32 = arith.constant 0 : i32
    %c0_i32_0 = arith.constant 0 : i32
    return %arg0, %c0_i32 : i32, i32
  }
}

</mosaic_0001>

<bundles_post_ra>
// kernel: tpu_custom_call.1
= control target key start
LH: loop header
LB: loop body
LE: loop exit
PB: predicated region body
PF: predicated region fallthrough
CT: control target
= control target key end

     0   :  { %11 = vsyncpa [#allocation3], 0  ;;  %s606_s24 = smov [#allocation2]   ;;  %s607_s26 = smov 128   ;;  %s776_s0 = inlined_call_operand.vmem [shape: f32[16,128], index: 0, kind: input, shape index: {}]   ;;  %s777_s1 = inlined_call_operand.vmem [shape: bf16[128,128], index: 1, kind: input, shape index: {}]   ;;  %s778_s2 = inlined_call_operand.vmem [shape: bf16[128,32], index: 2, kind: input, shape index: {}]   ;;  %s779_s3 = inlined_call_operand.vmem [shape: bf16[32,32], index: 3, kind: input, shape index: {}]   ;;  %s780_s4 = inlined_call_operand.vmem [shape: f32[32,4], index: 4, kind: input, shape index: {}]   ;;  %s781_s5 = inlined_call_operand.hbm [shape: f32[10,128], index: 5, kind: input, shape index: {}]   ;;  %s782_s6 = inlined_call_operand.vmem [shape: f32[16,4], index: 6, kind: output, shape index: {}]  }
   0x1   :  { %s26_s23 = sshll.u32 %s781_s5, 4  ;;  %s28_s25 = sshll.u32 %s606_s24, 4  ;;  %s27_s23 = int_to_ptr.hbm [resolvable:$true] %s26_s23  ;;  %s29_s25 = int_to_ptr.vmem [resolvable:$true] %s28_s25 }
   0x2   :  { %s608_s27 = smov 8  }
   0x3   :  { %34 = dma.hbm_to_vmem [thread:$0]  %s27_s23, 256, %s29_s25, [#allocation3], %s607_s26, %s607_s26, %s608_s27  }
   0x4   :  { %604 = dma.done.wait [#allocation3], 256  }
   0x5   :  { %605 = vsyncadd [#allocation3], 4294967040  ;;  %v548_v0 = vld [vmem:[%s777_s1 + $0x38] sm:$0xff]  ;;  %v547_v1 = vld [vmem:[%s777_s1 + $0x30] sm:$0xff]  ;;  %v609_v21 = vmov 128.0   ;;  %vm267_vm7 = vcmask 261120  }
   0x6   :  { %110 = vmatpush.bf16.msra.mxu0 %v548_v0  ;;  %v546_v2 = vld [vmem:[%s777_s1 + $0x28] sm:$0xff]  ;;  %v545_v3 = vld [vmem:[%s777_s1 + $0x20] sm:$0xff]  ;;  %v544_v4 = vld [vmem:[%s777_s1 + $0x18] sm:$0xff]  ;;  %564 = vrcp.f32 %v609_v21 }
   0x7   :  { %v543_v5 = vld [vmem:[%s777_s1 + $0x10] sm:$0xff]  ;;  %v542_v6 = vld [vmem:[%s777_s1 + $0x8] sm:$0xff]  ;;  %v541_v7 = vld [vmem:[%s777_s1] sm:$0xff] }
   0x8   :  { %v42_v8 = vld [vmem:[%s776_s0] sm:$0xff]  ;;  %v43_v9 = vld [vmem:[%s776_s0 + $0x8] sm:$0xff]  ;;  %v556_v23 = vld [vmem:[%s778_s2 + $0x38] sm:$0xff] }
   0x9   :  { %v44_v10 = vpack.c.bf16 %v43_v9, %v42_v8  ;;  %v679_v11 = vld [vmem:[#allocation2] sm:$0xff]  ;;  %251 = vmatpush.bf16.msra.mxu1 %v556_v23  ;;  %v555_v25 = vld [vmem:[%s778_s2 + $0x30] sm:$0xff]  ;;  %v554_v27 = vld [vmem:[%s778_s2 + $0x28] sm:$0xff] }
   0xa   :  { %111 = vmatpush.bf16.msra.mxu0 %v547_v1  ;;  %v61_v12 = vperm.slane %v679_v11, 0  ;;  %v553_v29 = vld [vmem:[%s778_s2 + $0x20] sm:$0xff]  ;;  %v552_v31 = vld [vmem:[%s778_s2 + $0x18] sm:$0xff]  ;;  %v551_v35 = vld [vmem:[%s778_s2 + $0x10] sm:$0xff]  ;;  %v182_v8 = vperm.slane %v679_v11, 2 }
   0xb   :  { %v550_v39 = vld [vmem:[%s778_s2 + $0x8] sm:$0xff]  ;;  %v549_v42 = vld [vmem:[%s778_s2] sm:$0xff] }
   0xc   :  { %v565_v22 = vpop.eup %564 }
   0xd   :  { %v131_v24 = vmul.f32 128.0, %v565_v22  ;;  %252 = vmatpush.bf16.msra.mxu1 %v555_v25  ;;  %vm135_vm0 = vweird.f32 %v565_v22 }
   0xe   :  { %112 = vmatpush.bf16.msra.mxu0 %v546_v2  ;;  %v179_v2 = vperm.slane %v679_v11, 1 }
   0xf   :  { %v132_v26 = vsub.f32 1.0, %v131_v24 }
  0x11   :  { %v133_v28 = vmul.f32 %v565_v22, %v132_v26  ;;  %253 = vmatpush.bf16.msra.mxu1 %v554_v27  ;;  %v610_v27 = vmov 32.0  }
  0x12   :  { %113 = vmatpush.bf16.msra.mxu0 %v545_v3 }
  0x13   :  { %v134_v30 = vadd.f32 %v565_v22, %v133_v28 }
  0x15   :  { %254 = vmatpush.bf16.msra.mxu1 %v553_v29  ;;  %v136_v32 = vsel %vm135_vm0, %v565_v22, %v134_v30 }
  0x16   :  { %114 = vmatpush.bf16.msra.mxu0 %v544_v4 }
  0x19   :  { %255 = vmatpush.bf16.msra.mxu1 %v552_v31 }
  0x1a   :  { %115 = vmatpush.bf16.msra.mxu0 %v543_v5 }
  0x1d   :  { %256 = vmatpush.bf16.msra.mxu1 %v551_v35 }
  0x1e   :  { %116 = vmatpush.bf16.msra.mxu0 %v542_v6 }
  0x21   :  { %257 = vmatpush.bf16.msra.mxu1 %v550_v39  ;;  %v558_v39 = vld [vmem:[%s779_s3 + $0x8] sm:$0xff] }
  0x22   :  { %117 = vmatpush.bf16.msra.mxu0 %v541_v7  ;;  %358 = vmatpush.bf16.msra.mxu2 %v558_v39 }
  0x25   :  { %118 = vmatmul.bf16.vlgmr.msra.gmra.mxu0 %v44_v10  ;;  %258 = vmatpush.bf16.msra.mxu1 %v549_v42 }
  0xa2   :  { %v119_v13 = vpop.f32.mrf.mxu0 }
  0xa3   :  { %v120_v14 = vadd.f32 %v119_v13, %v61_v12 }
  0xa5   :  { %v682_v15 = vmax.f32 %v120_v14, 0.0  ;;  %v202_v14 = vperm.slane %v679_v11, 3 }
  0xa7   :  { %126 = vadd.xlane.f32.xlu0 %v682_v15  ;;  %v139_v16 = vmul.f32 %v682_v15, %v682_v15 }
  0xa9   :  { %141 = vadd.xlane.f32.xlu1 %v139_v16 }
  0xaa   :  { %v121_v17 = vpop.f32.mrf.mxu0 }
  0xab   :  { %v122_v18 = vadd.f32 %v121_v17, %v61_v12 }
  0xad   :  { %v687_v19 = vmax.f32 %v122_v18, 0.0 }
  0xaf   :  { %128 = vadd.xlane.f32.xlu0 %v687_v19  ;;  %v140_v20 = vmul.f32 %v687_v19, %v687_v19 }
  0xb1   :  { %143 = vadd.xlane.f32.xlu1 %v140_v20 }
 0x11a   :  { %v127_v33 = vpop.xlane.xlu0 %126 }
 0x11b   :  { %v137_v34 = vmul.f32 %v136_v32, %v127_v33 }
 0x11c   :  { %v142_v36 = vpop.xlane.xlu1 %141 }
 0x11d   :  { %v147_v37 = vmul.f32 %v137_v34, %v137_v34  ;;  %v145_v38 = vmul.f32 %v142_v36, %v136_v32  ;;  %v153_v63 = vsub.f32 %v682_v15, %v137_v34 }
 0x11f   :  { %v149_v40 = vsub.f32 %v145_v38, %v147_v37 }
 0x121   :  { %v151_v41 = vmax.f32 %v149_v40, 0.0 }
 0x122   :  { %v129_v43 = vpop.xlane.xlu0 %128 }
 0x123   :  { %v155_v44 = vadd.f32 1e-05, %v151_v41  ;;  %v138_v45 = vmul.f32 %v136_v32, %v129_v43  ;;  %v557_v41 = vld [vmem:[%s779_s3] sm:$0xff] }
 0x124   :  { %v144_v46 = vpop.xlane.xlu1 %143  ;;  %359 = vmatpush.bf16.msra.mxu2 %v557_v41 }
 0x125   :  { %566 = vrsqrt.f32 %v155_v44  ;;  %v148_v47 = vmul.f32 %v138_v45, %v138_v45  ;;  %v146_v48 = vmul.f32 %v144_v46, %v136_v32  ;;  %vm163_vm2 = vweird.f32 %v155_v44 }
 0x126   :  { %v154_v4 = vsub.f32 %v687_v19, %v138_v45 }
 0x127   :  { %v150_v49 = vsub.f32 %v146_v48, %v148_v47 }
 0x129   :  { %v152_v50 = vmax.f32 %v150_v49, 0.0 }
 0x12b   :  { %v567_v51 = vpop.eup %566  ;;  %v156_v53 = vadd.f32 1e-05, %v152_v50 }
 0x12c   :  { %v158_v52 = vmul.f32 %v567_v51, %v155_v44  ;;  %vm164_vm1 = vweird.f32 %v567_v51 }
 0x12d   :  { %568 = vrsqrt.f32 %v156_v53  ;;  %vm165_vm3 = vmor %vm163_vm2, %vm164_vm1  ;;  %vm173_vm5 = vweird.f32 %v156_v53 }
 0x12e   :  { %v159_v54 = vmul.f32 %v567_v51, %v158_v52  ;;  %570 = vrcp.f32 %v610_v27  ;;  %v427_v27 = vld [vmem:[%s780_s4 + $0x18] sm:$0xff] }
 0x12f   :  { %447 = vmatpush.msra.mxu3 %v427_v27 }
 0x130   :  { %v160_v55 = vmul.f32 0.5, %v159_v54 }
 0x132   :  { %v161_v56 = vsub.f32 1.5, %v160_v55 }
 0x133   :  { %v569_v57 = vpop.eup %568 }
 0x134   :  { %v168_v58 = vmul.f32 %v569_v57, %v156_v53  ;;  %v162_v59 = vmul.f32 %v567_v51, %v161_v56  ;;  %vm174_vm4 = vweird.f32 %v569_v57  ;;  %v571_v28 = vpop.eup %570 }
 0x135   :  { %vm175_vm6 = vmor %vm173_vm5, %vm174_vm4  ;;  %v275_v29 = vmul.f32 32.0, %v571_v28  ;;  %vm279_vm8 = vweird.f32 %v571_v28  ;;  %vm458_vm5 = vcmask 31744  }
 0x136   :  { %v169_v60 = vmul.f32 %v569_v57, %v168_v58  ;;  %v166_v62 = vsel %vm165_vm3, %v567_v51, %v162_v59 }
 0x137   :  { %v177_v1 = vmul.f32 %v166_v62, %v153_v63  ;;  %v276_v30 = vsub.f32 1.0, %v275_v29 }
 0x138   :  { %v170_v61 = vmul.f32 0.5, %v169_v60 }
 0x139   :  { %v180_v7 = vmul.f32 %v179_v2, %v177_v1  ;;  %v277_v31 = vmul.f32 %v571_v28, %v276_v30  ;;  %v425_v30 = vld [vmem:[%s780_s4 + $0x8] sm:$0xff] }
 0x13a   :  { %v171_v0 = vsub.f32 1.5, %v170_v61 }
 0x13b   :  { %v183_v10 = vadd.f32 %v182_v8, %v180_v7  ;;  %v278_v32 = vadd.f32 %v571_v28, %v277_v31 }
 0x13c   :  { %v172_v3 = vmul.f32 %v569_v57, %v171_v0 }
 0x13d   :  { %v730_v33 = vsel %vm279_vm8, %v571_v28, %v278_v32  ;;  %v426_v28 = vld [vmem:[%s780_s4 + $0x10] sm:$0xff] }
 0x13e   :  { %v176_v5 = vsel %vm175_vm6, %v569_v57, %v172_v3  ;;  %448 = vmatpush.msra.mxu3 %v426_v28 }
 0x13f   :  { %v178_v6 = vmul.f32 %v176_v5, %v154_v4 }
 0x140   :  { %449 = vmatpush.msra.mxu3 %v425_v30 }
 0x141   :  { %v181_v9 = vmul.f32 %v179_v2, %v178_v6  ;;  %v325_v2 = vperm.slane %v679_v11, 4 }
 0x143   :  { %v184_v12 = vadd.f32 %v182_v8, %v181_v9  ;;  %v328_v8 = vperm.slane %v679_v11, 5 }
 0x145   :  { %v185_v13 = vpack.c.bf16 %v184_v12, %v183_v10 }
 0x147   :  { %259 = vmatmul.bf16.vlgmr.msra.gmra.mxu1 %v185_v13 }
 0x1c4   :  { %v260_v15 = vpop.f32.mrf.mxu1 }
 0x1c5   :  { %v261_v16 = vadd.f32 %v260_v15, %v202_v14 }
 0x1c7   :  { %v721_v17 = vmax.f32 %v261_v16, 0.0 }
 0x1c9   :  { %v268_v18 = vsel %vm267_vm7, %v721_v17, 0.0  ;;  %v283_v19 = vmul.f32 %v721_v17, %v721_v17 }
 0x1ca   :  { %269 = vadd.xlane.f32.xlu2 %v268_v18 }
 0x1cb   :  { %v285_v20 = vsel %vm267_vm7, %v283_v19, 0.0 }
 0x1cc   :  { %v262_v21 = vpop.f32.mrf.mxu1  ;;  %286 = vadd.xlane.f32.xlu0 %v285_v20 }
 0x1cd   :  { %v263_v22 = vadd.f32 %v262_v21, %v202_v14  ;;  %v336_v14 = vperm.slane %v679_v11, 6 }
 0x1cf   :  { %v266_v23 = vmax.f32 %v263_v22, 0.0 }
 0x1d1   :  { %v271_v24 = vsel %vm267_vm7, %v266_v23, 0.0  ;;  %v284_v25 = vmul.f32 %v266_v23, %v266_v23 }
 0x1d2   :  { %272 = vadd.xlane.f32.xlu2 %v271_v24 }
 0x1d3   :  { %v288_v26 = vsel %vm267_vm7, %v284_v25, 0.0 }
 0x1d4   :  { %289 = vadd.xlane.f32.xlu1 %v288_v26 }
 0x23d   :  { %v270_v34 = vpop.xlane.xlu2 %269 }
 0x23e   :  { %v281_v35 = vmul.f32 %v730_v33, %v270_v34  ;;  %v424_v34 = vld [vmem:[%s780_s4] sm:$0xff] }
 0x23f   :  { %v287_v36 = vpop.xlane.xlu0 %286  ;;  %450 = vmatpush.msra.mxu3 %v424_v34 }
 0x240   :  { %v293_v37 = vmul.f32 %v281_v35, %v281_v35  ;;  %v291_v38 = vmul.f32 %v287_v36, %v730_v33  ;;  %v299_v63 = vsub.f32 %v721_v17, %v281_v35 }
 0x242   :  { %v295_v40 = vsub.f32 %v291_v38, %v293_v37 }
 0x244   :  { %v297_v42 = vmax.f32 %v295_v40, 0.0 }
 0x245   :  { %v273_v43 = vpop.xlane.xlu2 %272 }
 0x246   :  { %v301_v44 = vadd.f32 1e-05, %v297_v42  ;;  %v282_v45 = vmul.f32 %v730_v33, %v273_v43 }
 0x247   :  { %v290_v46 = vpop.xlane.xlu1 %289 }
 0x248   :  { %572 = vrsqrt.f32 %v301_v44  ;;  %v294_v47 = vmul.f32 %v282_v45, %v282_v45  ;;  %v292_v48 = vmul.f32 %v290_v46, %v730_v33  ;;  %vm309_vm10 = vweird.f32 %v301_v44 }
 0x249   :  { %v300_v4 = vsub.f32 %v266_v23, %v282_v45 }
 0x24a   :  { %v296_v49 = vsub.f32 %v292_v48, %v294_v47 }
 0x24c   :  { %v298_v50 = vmax.f32 %v296_v49, 0.0 }
 0x24e   :  { %v573_v51 = vpop.eup %572  ;;  %v302_v53 = vadd.f32 1e-05, %v298_v50 }
 0x24f   :  { %v304_v52 = vmul.f32 %v573_v51, %v301_v44  ;;  %vm310_vm9 = vweird.f32 %v573_v51 }
 0x250   :  { %574 = vrsqrt.f32 %v302_v53  ;;  %vm311_vm11 = vmor %vm309_vm10, %vm310_vm9  ;;  %vm319_vm13 = vweird.f32 %v302_v53 }
 0x251   :  { %v305_v54 = vmul.f32 %v573_v51, %v304_v52 }
 0x253   :  { %v306_v55 = vmul.f32 0.5, %v305_v54 }
 0x255   :  { %v307_v56 = vsub.f32 1.5, %v306_v55  ;;  %v41_v55 = vld [vmem:[#allocation2 + $0x8] sm:$0x3] }
 0x256   :  { %v575_v57 = vpop.eup %574 }
 0x257   :  { %v308_v58 = vmul.f32 %v573_v51, %v307_v56  ;;  %v314_v59 = vmul.f32 %v575_v57, %v302_v53  ;;  %vm320_vm12 = vweird.f32 %v575_v57 }
 0x258   :  { %vm321_vm14 = vmor %vm319_vm13, %vm320_vm12 }
 0x259   :  { %v315_v60 = vmul.f32 %v575_v57, %v314_v59  ;;  %v312_v62 = vsel %vm311_vm11, %v573_v51, %v308_v58  ;;  %v418_v58 = vperm.slane %v679_v11, 7  ;;  %v428_v11 = vperm.slane %v41_v55, 1 }
 0x25a   :  { %v323_v1 = vmul.f32 %v312_v62, %v299_v63 }
 0x25b   :  { %v316_v61 = vmul.f32 0.5, %v315_v60 }
 0x25c   :  { %v326_v7 = vmul.f32 %v325_v2, %v323_v1 }
 0x25d   :  { %v317_v0 = vsub.f32 1.5, %v316_v61  ;;  %v421_v61 = vperm.slane %v41_v55, 0 }
 0x25e   :  { %v329_v10 = vadd.f32 %v328_v8, %v326_v7 }
 0x25f   :  { %v318_v3 = vmul.f32 %v575_v57, %v317_v0 }
 0x261   :  { %v322_v5 = vsel %vm321_vm14, %v575_v57, %v318_v3 }
 0x262   :  { %v324_v6 = vmul.f32 %v322_v5, %v300_v4 }
 0x264   :  { %v327_v9 = vmul.f32 %v325_v2, %v324_v6 }
 0x266   :  { %v330_v12 = vadd.f32 %v328_v8, %v327_v9 }
 0x268   :  { %v331_v13 = vpack.c.bf16 %v330_v12, %v329_v10 }
 0x26a   :  { %538 = vmatmul.msk.bf16.vlgmr.msra.gmra.mxu2 %vm267_vm7, %v331_v13 }
 0x2ed   :  { %v361_v15 = vpop.f32.mrf.mxu2 }
 0x2ee   :  { %v362_v16 = vadd.f32 %v361_v15, %v336_v14 }
 0x2f0   :  { %v366_v17 = vmax.f32 %v362_v16, 0.0 }
 0x2f2   :  { %v368_v18 = vsel %vm267_vm7, %v366_v17, 0.0  ;;  %v376_v19 = vmul.f32 %v366_v17, %v366_v17 }
 0x2f3   :  { %369 = vadd.xlane.f32.xlu2 %v368_v18 }
 0x2f4   :  { %v378_v20 = vsel %vm267_vm7, %v376_v19, 0.0 }
 0x2f5   :  { %v363_v21 = vpop.f32.mrf.mxu2  ;;  %379 = vadd.xlane.f32.xlu0 %v378_v20 }
 0x2f6   :  { %v364_v22 = vadd.f32 %v363_v21, %v336_v14 }
 0x2f8   :  { %v367_v23 = vmax.f32 %v364_v22, 0.0 }
 0x2fa   :  { %v371_v24 = vsel %vm267_vm7, %v367_v23, 0.0  ;;  %v377_v25 = vmul.f32 %v367_v23, %v367_v23 }
 0x2fb   :  { %372 = vadd.xlane.f32.xlu1 %v371_v24 }
 0x2fc   :  { %v381_v26 = vsel %vm267_vm7, %v377_v25, 0.0 }
 0x2fd   :  { %382 = vadd.xlane.f32.xlu2 %v381_v26 }
 0x366   :  { %v370_v29 = vpop.xlane.xlu2 %369 }
 0x367   :  { %v374_v31 = vmul.f32 %v370_v29, %v730_v33 }
 0x368   :  { %v380_v32 = vpop.xlane.xlu0 %379 }
 0x369   :  { %v386_v35 = vmul.f32 %v374_v31, %v374_v31  ;;  %v384_v36 = vmul.f32 %v380_v32, %v730_v33  ;;  %v392_v56 = vsub.f32 %v366_v17, %v374_v31 }
 0x36b   :  { %v388_v37 = vsub.f32 %v384_v36, %v386_v35 }
 0x36d   :  { %v390_v38 = vmax.f32 %v388_v37, 0.0 }
 0x36e   :  { %v373_v39 = vpop.xlane.xlu1 %372 }
 0x36f   :  { %v394_v40 = vadd.f32 1e-05, %v390_v38  ;;  %v375_v41 = vmul.f32 %v373_v39, %v730_v33 }
 0x370   :  { %v383_v42 = vpop.xlane.xlu2 %382 }
 0x371   :  { %576 = vrsqrt.f32 %v394_v40  ;;  %v387_v43 = vmul.f32 %v375_v41, %v375_v41  ;;  %v385_v44 = vmul.f32 %v383_v42, %v730_v33  ;;  %vm402_vm0 = vweird.f32 %v394_v40 }
 0x372   :  { %v393_v3 = vsub.f32 %v367_v23, %v375_v41 }
 0x373   :  { %v389_v45 = vsub.f32 %v385_v44, %v387_v43 }
 0x375   :  { %v391_v46 = vmax.f32 %v389_v45, 0.0 }
 0x377   :  { %v577_v47 = vpop.eup %576  ;;  %v395_v49 = vadd.f32 1e-05, %v391_v46 }
 0x378   :  { %v397_v48 = vmul.f32 %v577_v47, %v394_v40  ;;  %vm403_vm15 = vweird.f32 %v577_v47 }
 0x379   :  { %578 = vrsqrt.f32 %v395_v49  ;;  %vm404_vm1 = vmor %vm402_vm0, %vm403_vm15  ;;  %vm412_vm3 = vweird.f32 %v395_v49 }
 0x37a   :  { %v398_v50 = vmul.f32 %v577_v47, %v397_v48 }
 0x37c   :  { %v399_v51 = vmul.f32 0.5, %v398_v50 }
 0x37e   :  { %v400_v52 = vsub.f32 1.5, %v399_v51 }
 0x37f   :  { %v579_v53 = vpop.eup %578 }
 0x380   :  { %v401_v54 = vmul.f32 %v577_v47, %v400_v52  ;;  %v407_v57 = vmul.f32 %v579_v53, %v395_v49  ;;  %vm413_vm2 = vweird.f32 %v579_v53 }
 0x381   :  { %vm414_vm4 = vmor %vm412_vm3, %vm413_vm2 }
 0x382   :  { %v405_v33 = vsel %vm404_vm1, %v577_v47, %v401_v54  ;;  %v408_v59 = vmul.f32 %v579_v53, %v407_v57 }
 0x383   :  { %v416_v60 = vmul.f32 %v405_v33, %v392_v56 }
 0x384   :  { %v409_v62 = vmul.f32 0.5, %v408_v59 }
 0x385   :  { %v419_v63 = vmul.f32 %v418_v58, %v416_v60 }
 0x386   :  { %v410_v0 = vsub.f32 1.5, %v409_v62 }
 0x387   :  { %v422_v1 = vadd.f32 %v421_v61, %v419_v63 }
 0x388   :  { %v411_v2 = vmul.f32 %v579_v53, %v410_v0 }
 0x389   :  { %539 = vmatmul.msk.f32.vlgmr.msra.gmra.mxu3 %vm267_vm7, %v422_v1 }
 0x38a   :  { %v415_v4 = vsel %vm414_vm4, %v579_v53, %v411_v2 }
 0x38b   :  { %v417_v5 = vmul.f32 %v415_v4, %v393_v3 }
 0x38d   :  { %v420_v6 = vmul.f32 %v418_v58, %v417_v5 }
 0x38f   :  { %v423_v7 = vadd.f32 %v421_v61, %v420_v6 }
 0x391   :  { %540 = vmatmul.msk.f32.gmra.mxu3 %vm267_vm7, %v423_v7 }
 0x40c   :  { %v452_v8 = vpop.f32.mrf.mxu3 }
 0x40d   :  { %v453_v9 = vadd.f32 %v452_v8, %v428_v11 }
 0x40f   :  { %459 = vst.msk [vmem:[%s782_s6] sm:$0xff] %vm458_vm5, %v453_v9 }
 0x414   :  { %v455_v10 = vpop.f32.mrf.mxu3 }
 0x415   :  { %v456_v12 = vadd.f32 %v455_v10, %v428_v11 }
 0x417   :  { %460 = vst.msk [vmem:[%s782_s6 + $0x8] sm:$0xff] %vm458_vm5, %v456_v12 }
 0x418   :  { %465 = vsyncpa [#allocation3], 1 }

</bundles_post_ra>
